<compile_context>
chip_gen: v7x
topology: tpu7x:2x2x1
jax: 0.10.0
libtpu: 0.0.40
codegen_flags: <defaults>
</compile_context>

<pallas_src>
import functools

import jax
import jax.numpy as jnp
from jax.experimental import pallas as pl
from jax.experimental.pallas import tpu as pltpu


# ---------------------------------------------------------------------------
# Pallas kernel: tiled (patches @ w_scaled) + bias, f32 accumulation, bf16 out
# ---------------------------------------------------------------------------

def _conv_bn_kernel(p_ref, w_ref, bias_ref, o_ref, acc_ref):
    k = pl.program_id(2)

    @pl.when(k == 0)
    def _():
        acc_ref[...] = jnp.zeros_like(acc_ref)

    acc_ref[...] += jnp.dot(p_ref[...], w_ref[...],
                            preferred_element_type=jnp.float32)

    @pl.when(k == pl.num_programs(2) - 1)
    def _():
        # Post-accumulation elementwise in f32 (exact), single bf16 store.
        o_ref[...] = (acc_ref[...] + bias_ref[...]).astype(o_ref.dtype)


def conv_bn_matmul(patches, w_mat, bias, *, tm, tn, tk, vmem_limit):
    """patches: (M, K) bf16, w_mat: (K, C) bf16 (BN scale folded), bias: (1, C) f32."""
    M, K = patches.shape
    Kw, C = w_mat.shape
    assert K == Kw and M % tm == 0 and K % tk == 0 and C % tn == 0
    grid = (M // tm, C // tn, K // tk)

    cost = pl.CostEstimate(
        flops=2 * M * K * C,
        transcendentals=0,
        bytes_accessed=(M * K * 2 + K * C * 2 + M * C * 2 + C * 4),
    )

    return pl.pallas_call(
        _conv_bn_kernel,
        out_shape=jax.ShapeDtypeStruct((M, C), jnp.bfloat16),
        grid_spec=pltpu.PrefetchScalarGridSpec(
            num_scalar_prefetch=0,
            grid=grid,
            in_specs=[
                pl.BlockSpec((tm, tk), lambda i, j, k: (i, k)),
                pl.BlockSpec((tk, tn), lambda i, j, k: (k, j)),
                # bias block is constant along M and K -> stays resident.
                pl.BlockSpec((1, tn), lambda i, j, k: (0, j)),
            ],
            out_specs=pl.BlockSpec((tm, tn), lambda i, j, k: (i, j)),
            scratch_shapes=[pltpu.VMEM((tm, tn), jnp.float32)],
        ),
        compiler_params=pltpu.CompilerParams(
            dimension_semantics=("parallel", "parallel", "arbitrary"),
            vmem_limit_bytes=vmem_limit,
        ),
        cost_estimate=cost,
    )(patches, w_mat, bias)


# ---------------------------------------------------------------------------
# Plain-JAX glue: im2col, BN folding, generation-aware tile selection
# ---------------------------------------------------------------------------

def _round_up(x, m):
    return (x + m - 1) // m * m


def _tpu_tiling_defaults():
    """Return (tn_target, vmem_limit_bytes) gated by TPU generation."""
    try:
        kind = jax.devices()[0].device_kind.lower()
    except Exception:  # pragma: no cover - defensive
        kind = ""
    if "v7" in kind:
        # 256-wide MXU, but only 64 MiB physical VMEM per TensorCore.
        return 256, 48 * 1024 * 1024
    if "v6" in kind:
        # 2x256x256 MXU, 128 MiB VMEM.
        return 256, 96 * 1024 * 1024
    if "v5e" in kind or "v5 lite" in kind or "v5lite" in kind:
        # 4x128x128 MXU, 128 MiB VMEM: tn=256 buys nothing on the matmul unit.
        return 128, 96 * 1024 * 1024
    # Unknown / older generations: conservative defaults.
    return 128, 32 * 1024 * 1024


def _pick_tk(k_pad, cap=2048):
    """Largest multiple-of-128 divisor of k_pad not exceeding `cap`."""
    tk = 128
    cand = 128
    while cand <= min(k_pad, cap):
        if k_pad % cand == 0:
            tk = cand
        cand += 128
    return tk


def _im2col(x_nhwc, ksize, stride, padding):
    """Returns (N*Ho*Wo, ksize*ksize*Cin) patches and (N, Ho, Wo)."""
    N, H, W, Cin = x_nhwc.shape
    xp = jnp.pad(x_nhwc, ((0, 0), (padding, padding), (padding, padding), (0, 0)))
    Ho = (H + 2 * padding - ksize) // stride + 1
    Wo = (W + 2 * padding - ksize) // stride + 1
    cols = []
    for ky in range(ksize):
        for kx in range(ksize):
            cols.append(
                xp[:, ky:ky + stride * (Ho - 1) + 1:stride,
                      kx:kx + stride * (Wo - 1) + 1:stride, :])
    patches = jnp.stack(cols, axis=3)            # (N, Ho, Wo, k*k, Cin)
    return patches.reshape(N * Ho * Wo, ksize * ksize * Cin), (N, Ho, Wo)


def cnnbn_forward(x_nchw, params, *, stride=1, padding=0, bn=True, eps=1e-5):
    """out = bn( conv2d(x, w, stride, padding) )   (eval-mode BN, no conv bias)."""
    w = params["conv_w"]                          # (Cout, Cin, kh, kw)
    Cout, Cin, kh, kw = w.shape

    # NOTE: a multi-layer model should keep activations NHWC between layers and
    # only transpose at the model boundary; here we follow the NCHW module API.
    x_nhwc = jnp.transpose(x_nchw, (0, 2, 3, 1)).astype(jnp.bfloat16)
    patches, (N, Ho, Wo) = _im2col(x_nhwc, kh, stride, padding)   # bf16
    M, K = patches.shape

    # Eval-mode BN folded into per-channel scale/bias (f32, host-side, free).
    if bn:
        scale = params["bn_gamma"] / jnp.sqrt(params["bn_var"] + eps)
        bias = params["bn_beta"] - params["bn_mean"] * scale
    else:
        scale = jnp.ones((Cout,), jnp.float32)
        bias = jnp.zeros((Cout,), jnp.float32)

    # (Cout, Cin, kh, kw) -> (kh*kw*Cin, Cout) matching im2col (ky, kx, cin)
    # order, with BN scale folded into the weight columns in f32 before bf16.
    w_mat = (jnp.transpose(w, (2, 3, 1, 0)).reshape(K, Cout)
             * scale[None, :]).astype(jnp.bfloat16)

    # ---- generation-aware, lane-dense tile selection -----------------------
    tn_target, vmem_limit = _tpu_tiling_defaults()

    C_pad = _round_up(Cout, 128)
    tn = tn_target if C_pad % tn_target == 0 else 128
    C_pad = _round_up(C_pad, tn)
    # TODO(synk): for Cout < 128, 94%+ of the lane dim is zero padding; batch
    #             several convs' weight columns into one slab to amortize it.

    K_pad = _round_up(K, 128)
    tk = _pick_tk(K_pad)                          # divisor of K_pad, no inflation

    tm = min(512, _round_up(M, 8))
    M_pad = _round_up(M, tm)

    patches_p = jnp.pad(patches, ((0, M_pad - M), (0, K_pad - K)))
    w_p = jnp.pad(w_mat, ((0, K_pad - K), (0, C_pad - Cout)))
    bias_p = jnp.pad(bias[None, :], ((0, 0), (0, C_pad - Cout)))

    out_p = conv_bn_matmul(patches_p, w_p, bias_p,
                           tm=tm, tn=tn, tk=tk, vmem_limit=vmem_limit)

    out = out_p[:M, :Cout].reshape(N, Ho, Wo, Cout)
    # Back to NCHW, f32 at the module boundary (matches PyTorch dtype).
    return jnp.transpose(out, (0, 3, 1, 2)).astype(jnp.float32)


# ---------------------------------------------------------------------------
# Parameters + demo
# ---------------------------------------------------------------------------

def init_cnnbn_params(key, in_planes, out_planes, kernel_size):
    ks = jax.random.split(key, 5)
    fan_in = in_planes * kernel_size * kernel_size
    return {
        "conv_w": jax.random.normal(
            ks[0], (out_planes, in_planes, kernel_size, kernel_size),
            jnp.float32) / jnp.sqrt(fan_in),
        "bn_gamma": 1.0 + 0.1 * jax.random.normal(ks[1], (out_planes,), jnp.float32),
        "bn_beta": 0.1 * jax.random.normal(ks[2], (out_planes,), jnp.float32),
        "bn_mean": 0.05 * jax.random.normal(ks[3], (out_planes,), jnp.float32),
        "bn_var": 1.0 + 0.1 * jnp.abs(jax.random.normal(ks[4], (out_planes,), jnp.float32)),
    }


def _reference(x_nchw, params, *, stride, padding, bn, eps=1e-5):
    """Pure-JAX reference (f32) for correctness check."""
    y = jax.lax.conv_general_dilated(
        x_nchw, params["conv_w"], window_strides=(stride, stride),
        padding=[(padding, padding), (padding, padding)],
        dimension_numbers=("NCHW", "OIHW", "NCHW"))
    if bn:
        scale = params["bn_gamma"] / jnp.sqrt(params["bn_var"] + eps)
        bias = params["bn_beta"] - params["bn_mean"] * scale
        y = y * scale[None, :, None, None] + bias[None, :, None, None]
    return y


if __name__ == "__main__":
    key = jax.random.PRNGKey(0)
    kx, kp = jax.random.split(key)

    # CNNBN defaults: kernel_size=3, stride=1, padding=0, bias=False, bn=True
    in_planes, out_planes, ksize, stride, padding = 4, 8, 3, 1, 0
    x = jax.random.normal(kx, (2, in_planes, 16, 16), jnp.float32)   # NCHW

    params = init_cnnbn_params(kp, in_planes, out_planes, ksize)

    fwd = jax.jit(functools.partial(
        cnnbn_forward, stride=stride, padding=padding, bn=True))
    out = fwd(x, params)
    jax.block_until_ready(out)

    Ho = (16 + 2 * padding - ksize) // stride + 1
    assert out.shape == (2, out_planes, Ho, Ho), out.shape
    assert bool(jnp.all(jnp.isfinite(out)))

    ref = _reference(x, params, stride=stride, padding=padding, bn=True)
    err = jnp.max(jnp.abs(out - ref))
    # bf16 operands + bf16 output (f32 MXU accumulation): ~1e-2 abs error budget.
    assert bool(err < 5e-2), f"max abs error {err}"

    print("KERNEL_OK")
</pallas_src>

<mosaic_0001>
module attributes {stable_mosaic.version = 11 : i64} {
  func.func @_conv_bn_kernel(%arg0: i32, %arg1: i32, %arg2: i32, %arg3: memref<392x128xbf16, #tpu.memory_space<vmem>>, %arg4: memref<128x128xbf16, #tpu.memory_space<vmem>>, %arg5: memref<1x128xf32, #tpu.memory_space<vmem>>, %arg6: memref<392x128xbf16, #tpu.memory_space<vmem>>, %arg7: memref<392x128xf32, #tpu.memory_space<vmem>>) attributes {dimension_semantics = [#tpu.dimension_semantics<parallel>, #tpu.dimension_semantics<parallel>, #tpu.dimension_semantics<arbitrary>], iteration_bounds = array<i64: 1, 1, 1>, scalar_prefetch = 0 : i64, scratch_operands = 1 : i64, tpu.core_type = #tpu.core_type<tc>, window_params = [{transform_indices = @transform_0, window_bounds = array<i64: 392, 128>}, {transform_indices = @transform_1, window_bounds = array<i64: 128, 128>}, {transform_indices = @transform_2, window_bounds = array<i64: 1, 128>}, {transform_indices = @transform_3, window_bounds = array<i64: 392, 128>}]} {
    %c0_i32 = arith.constant 0 : i32
    %0 = arith.cmpi eq, %arg2, %c0_i32 : i32
    %1 = arith.extui %0 : i1 to i32
    %c0_i32_0 = arith.constant 0 : i32
    %2 = arith.cmpi ne, %1, %c0_i32_0 : i32
    scf.if %2 {
      %cst_10 = arith.constant 0.000000e+00 : f32
      %12 = vector.broadcast %cst_10 : f32 to vector<392x128xf32>
      %c0_11 = arith.constant 0 : index
      %c0_12 = arith.constant 0 : index
      %13 = vector.load %arg7[%c0_11, %c0_12] : memref<392x128xf32, #tpu.memory_space<vmem>>, vector<392x128xf32>
      tpu.vector_store %arg7[%c0_11, %c0_12], %12 {strides = array<i32>} : memref<392x128xf32, #tpu.memory_space<vmem>>, vector<392x128xf32>,
    } else {
    }
    %c0 = arith.constant 0 : index
    %c0_1 = arith.constant 0 : index
    %3 = vector.load %arg7[%c0, %c0_1] : memref<392x128xf32, #tpu.memory_space<vmem>>, vector<392x128xf32>
    %c0_2 = arith.constant 0 : index
    %c0_3 = arith.constant 0 : index
    %4 = vector.load %arg3[%c0_2, %c0_3] : memref<392x128xbf16, #tpu.memory_space<vmem>>, vector<392x128xbf16>
    %c0_4 = arith.constant 0 : index
    %c0_5 = arith.constant 0 : index
    %5 = vector.load %arg4[%c0_4, %c0_5] : memref<128x128xbf16, #tpu.memory_space<vmem>>, vector<128x128xbf16>
    %cst = arith.constant dense<0.000000e+00> : vector<392x128xf32>
    %6 = tpu.matmul %4, %5, %cst {dimension_numbers = #tpu.dot_dimension_numbers<[1], [0], [0], [1], [0, 0, 1, 1], [], []>} : vector<392x128xbf16>, vector<128x128xbf16>, vector<392x128xf32> -> vector<392x128xf32>
    %7 = arith.addf %3, %6 : vector<392x128xf32>
    %c0_6 = arith.constant 0 : index
    %c0_7 = arith.constant 0 : index
    %8 = vector.load %arg7[%c0_6, %c0_7] : memref<392x128xf32, #tpu.memory_space<vmem>>, vector<392x128xf32>
    tpu.vector_store %arg7[%c0_6, %c0_7], %7 {strides = array<i32>} : memref<392x128xf32, #tpu.memory_space<vmem>>, vector<392x128xf32>,
    %c0_i32_8 = arith.constant 0 : i32
    %9 = arith.cmpi eq, %arg2, %c0_i32_8 : i32
    %10 = arith.extui %9 : i1 to i32
    %c0_i32_9 = arith.constant 0 : i32
    %11 = arith.cmpi ne, %10, %c0_i32_9 : i32
    scf.if %11 {
      %c0_10 = arith.constant 0 : index
      %c0_11 = arith.constant 0 : index
      %12 = vector.load %arg7[%c0_10, %c0_11] : memref<392x128xf32, #tpu.memory_space<vmem>>, vector<392x128xf32>
      %c0_12 = arith.constant 0 : index
      %c0_13 = arith.constant 0 : index
      %13 = vector.load %arg5[%c0_12, %c0_13] : memref<1x128xf32, #tpu.memory_space<vmem>>, vector<1x128xf32>
      %14 = vector.broadcast %13 : vector<1x128xf32> to vector<392x128xf32>
      %15 = arith.addf %12, %14 : vector<392x128xf32>
      %16 = arith.truncf %15 : vector<392x128xf32> to vector<392x128xbf16>
      %c0_14 = arith.constant 0 : index
      %c0_15 = arith.constant 0 : index
      %17 = vector.load %arg6[%c0_14, %c0_15] : memref<392x128xbf16, #tpu.memory_space<vmem>>, vector<392x128xbf16>
      tpu.vector_store %arg6[%c0_14, %c0_15], %16 {strides = array<i32>} : memref<392x128xbf16, #tpu.memory_space<vmem>>, vector<392x128xbf16>,
    } else {
    }
    return
  }
  func.func @transform_0(%arg0: i32, %arg1: i32, %arg2: i32) -> (i32, i32) {
    %c0_i32 = arith.constant 0 : i32
    return %arg0, %arg2 : i32, i32
  }
  func.func @transform_1(%arg0: i32, %arg1: i32, %arg2: i32) -> (i32, i32) {
    %c0_i32 = arith.constant 0 : i32
    return %arg2, %arg1 : i32, i32
  }
  func.func @transform_2(%arg0: i32, %arg1: i32, %arg2: i32) -> (i32, i32) {
    %c0_i32 = arith.constant 0 : i32
    %c0_i32_0 = arith.constant 0 : i32
    return %c0_i32, %arg1 : i32, i32
  }
  func.func @transform_3(%arg0: i32, %arg1: i32, %arg2: i32) -> (i32, i32) {
    %c0_i32 = arith.constant 0 : i32
    return %arg0, %arg1 : i32, i32
  }
}

</mosaic_0001>

<bundles_post_ra>
// kernel: cnnbn_forward.1
= control target key start
LH: loop header
LB: loop body
LE: loop exit
PB: predicated region body
PF: predicated region fallthrough
CT: control target
= control target key end

     0   :  { %v1541_v0 = vmov 0.0   ;;  %vm1542_vm0 = vmmov 0   ;;  %s1857_s1 = inlined_call_operand.vmem [shape: bf16[128,128], index: 1, kind: input, shape index: {}]   ;;  %s1858_s0 = inlined_call_operand.vmem [shape: bf16[392,128], index: 0, kind: input, shape index: {}]   ;;  %s1859_s2 = inlined_call_operand.vmem [shape: f32[1,128], index: 2, kind: input, shape index: {}]   ;;  %s1860_s3 = inlined_call_operand.vmem [shape: bf16[392,128], index: 3, kind: output, shape index: {}]  }
   0x1   :  { %1374 = vmatprep.subr.bf16.mxu0 %v1541_v0  ;;  %v1508_v1 = vld [vmem:[%s1857_s1] sm:$0xff]   ;;  %1490 = vmatprep.subr.bf16.mxu1 %v1541_v0  ;;  %v1509_v2 = vld [vmem:[%s1857_s1 + $0x8] sm:$0xff]   ;;  %v1510_v3 = vld [vmem:[%s1857_s1 + $0x10] sm:$0xff]  }
   0x2   :  { %1390 = vmatprep.mubr.msk.bf16.mxu0 %vm1542_vm0, %v1541_v0  ;;  %1442 = vmatprep.mubr.msk.bf16.mxu1 %vm1542_vm0, %v1541_v0  ;;  %v1511_v4 = vld [vmem:[%s1857_s1 + $0x18] sm:$0xff]   ;;  %v1512_v5 = vld [vmem:[%s1857_s1 + $0x20] sm:$0xff]   ;;  %v1513_v6 = vld [vmem:[%s1857_s1 + $0x28] sm:$0xff]  }
   0x3   :  { %1375 = vmatpush3.bf16.msra.mxu0 %v1508_v1  ;;  %1498 = vmatpush3.bf16.msra.mxu1 %v1508_v1  ;;  %v1514_v7 = vld [vmem:[%s1857_s1 + $0x30] sm:$0xff]   ;;  %v1515_v8 = vld [vmem:[%s1857_s1 + $0x38] sm:$0xff]   ;;  %v1516_v9 = vld [vmem:[%s1858_s0] sm:$0xff]  }
   0x4   :  { %1376 = vmatprep.subr.bf16.mxu0 %v1541_v0  ;;  %1491 = vmatprep.subr.bf16.mxu1 %v1541_v0  ;;  %v1517_v10 = vld [vmem:[%s1858_s0 + $0x68] sm:$0xff]   ;;  %v1519_v12 = vld [vmem:[%s1858_s0 + $0x70] sm:$0xff]   ;;  %v1521_v14 = vld [vmem:[%s1858_s0 + $0x78] sm:$0xff]  }
   0x5   :  { %v1518_v11 = vld [vmem:[%s1858_s0 + $0x8] sm:$0xff]   ;;  %v1520_v13 = vld [vmem:[%s1858_s0 + $0x10] sm:$0xff]   ;;  %v1522_v15 = vld [vmem:[%s1858_s0 + $0x18] sm:$0xff]  }
   0x6   :  { %v1523_v16 = vld [vmem:[%s1858_s0 + $0x80] sm:$0xff]   ;;  %v1525_v18 = vld [vmem:[%s1858_s0 + $0x88] sm:$0xff]   ;;  %v1527_v20 = vld [vmem:[%s1858_s0 + $0x90] sm:$0xff]  }
   0x7   :  { %1377 = vmatpush3.bf16.msra.mxu0 %v1509_v2  ;;  %1499 = vmatpush3.bf16.msra.mxu1 %v1509_v2  ;;  %v1524_v17 = vld [vmem:[%s1858_s0 + $0x20] sm:$0xff]   ;;  %v1526_v19 = vld [vmem:[%s1858_s0 + $0x28] sm:$0xff]   ;;  %v1528_v21 = vld [vmem:[%s1858_s0 + $0x30] sm:$0xff]  }
   0x8   :  { %1378 = vmatprep.subr.bf16.mxu0 %v1541_v0  ;;  %1492 = vmatprep.subr.bf16.mxu1 %v1541_v0  ;;  %v1529_v22 = vld [vmem:[%s1858_s0 + $0x98] sm:$0xff]   ;;  %v1531_v24 = vld [vmem:[%s1858_s0 + $0xa0] sm:$0xff]   ;;  %v1533_v26 = vld [vmem:[%s1858_s0 + $0xa8] sm:$0xff]  }
   0x9   :  { %v1530_v23 = vld [vmem:[%s1858_s0 + $0x38] sm:$0xff]   ;;  %v1532_v25 = vld [vmem:[%s1858_s0 + $0x40] sm:$0xff]   ;;  %v1534_v27 = vld [vmem:[%s1858_s0 + $0x48] sm:$0xff]  }
   0xa   :  { %v1535_v28 = vld [vmem:[%s1858_s0 + $0xb0] sm:$0xff]   ;;  %v1537_v30 = vld [vmem:[%s1858_s0 + $0xb8] sm:$0xff]   ;;  %v1539_v32 = vld [vmem:[%s1858_s0 + $0xc0] ss:$0 sps:$4 sm:$0xff]  }
   0xb   :  { %1379 = vmatpush3.bf16.msra.mxu0 %v1510_v3  ;;  %1500 = vmatpush3.bf16.msra.mxu1 %v1510_v3  ;;  %v1536_v29 = vld [vmem:[%s1858_s0 + $0x50] sm:$0xff]   ;;  %v1538_v31 = vld [vmem:[%s1858_s0 + $0x58] sm:$0xff]   ;;  %v1540_v33 = vld [vmem:[%s1858_s0 + $0x60] sm:$0xff]  }
   0xc   :  { %1380 = vmatprep.subr.bf16.mxu0 %v1541_v0  ;;  %1493 = vmatprep.subr.bf16.mxu1 %v1541_v0  ;;  %v1731_v35 = vld [vmem:[%s1859_s2] ss:$0 sm:$0xff] }
   0xf   :  { %1381 = vmatpush3.bf16.msra.mxu0 %v1511_v4  ;;  %1501 = vmatpush3.bf16.msra.mxu1 %v1511_v4 }
  0x10   :  { %1382 = vmatprep.subr.bf16.mxu0 %v1541_v0  ;;  %1494 = vmatprep.subr.bf16.mxu1 %v1541_v0 }
  0x13   :  { %1383 = vmatpush3.bf16.msra.mxu0 %v1512_v5  ;;  %1502 = vmatpush3.bf16.msra.mxu1 %v1512_v5 }
  0x14   :  { %1384 = vmatprep.subr.bf16.mxu0 %v1541_v0  ;;  %1495 = vmatprep.subr.bf16.mxu1 %v1541_v0 }
  0x17   :  { %1385 = vmatpush3.bf16.msra.mxu0 %v1513_v6  ;;  %1503 = vmatpush3.bf16.msra.mxu1 %v1513_v6 }
  0x18   :  { %1386 = vmatprep.subr.bf16.mxu0 %v1541_v0  ;;  %1496 = vmatprep.subr.bf16.mxu1 %v1541_v0 }
  0x1b   :  { %1387 = vmatpush3.bf16.msra.mxu0 %v1514_v7  ;;  %1504 = vmatpush3.bf16.msra.mxu1 %v1514_v7 }
  0x1c   :  { %1388 = vmatprep.subr.bf16.mxu0 %v1541_v0  ;;  %1497 = vmatprep.subr.bf16.mxu1 %v1541_v0 }
  0x1f   :  { %1389 = vmatpush3.bf16.msra.mxu0 %v1515_v8  ;;  %1505 = vmatpush3.bf16.msra.mxu1 %v1515_v8 }
  0x22   :  { %1391 = vmatmul.mubr.bf16.vlgmr.msra.gmra.mrb[0].mxu0 %v1516_v9  ;;  %1443 = vmatmul.mubr.bf16.vlgmr.msra.gmra.mrb[0].mxu1 %v1517_v10 }
  0x23   :  { %1394 = vmatprep.mubr.msk.bf16.mxu0 %vm1542_vm0, %v1541_v0  ;;  %1446 = vmatprep.mubr.msk.bf16.mxu1 %vm1542_vm0, %v1541_v0 }
  0x2a   :  { %1395 = vmatmul.mubr.bf16.gmra.mrb[4].mxu0 %v1518_v11  ;;  %1447 = vmatmul.mubr.bf16.gmra.mrb[4].mxu1 %v1519_v12 }
  0x2b   :  { %1398 = vmatprep.mubr.msk.bf16.mxu0 %vm1542_vm0, %v1541_v0  ;;  %1450 = vmatprep.mubr.msk.bf16.mxu1 %vm1542_vm0, %v1541_v0 }
  0x32   :  { %1399 = vmatmul.mubr.bf16.gmra.mrb[8].mxu0 %v1520_v13  ;;  %1451 = vmatmul.mubr.bf16.gmra.mrb[8].mxu1 %v1521_v14 }
  0x33   :  { %1402 = vmatprep.mubr.msk.bf16.mxu0 %vm1542_vm0, %v1541_v0  ;;  %1454 = vmatprep.mubr.msk.bf16.mxu1 %vm1542_vm0, %v1541_v0 }
  0x3a   :  { %1403 = vmatmul.mubr.bf16.gmra.mrb[12].mxu0 %v1522_v15  ;;  %1455 = vmatmul.mubr.bf16.gmra.mrb[12].mxu1 %v1523_v16 }
  0x3b   :  { %1406 = vmatprep.mubr.msk.bf16.mxu0 %vm1542_vm0, %v1541_v0  ;;  %1458 = vmatprep.mubr.msk.bf16.mxu1 %vm1542_vm0, %v1541_v0 }
  0x42   :  { %1407 = vmatmul.mubr.bf16.gmra.mrb[16].mxu0 %v1524_v17  ;;  %1459 = vmatmul.mubr.bf16.gmra.mrb[16].mxu1 %v1525_v18 }
  0x43   :  { %1410 = vmatprep.mubr.msk.bf16.mxu0 %vm1542_vm0, %v1541_v0  ;;  %1462 = vmatprep.mubr.msk.bf16.mxu1 %vm1542_vm0, %v1541_v0 }
  0x4a   :  { %1411 = vmatmul.mubr.bf16.gmra.mrb[20].mxu0 %v1526_v19  ;;  %1463 = vmatmul.mubr.bf16.gmra.mrb[20].mxu1 %v1527_v20 }
  0x4b   :  { %1414 = vmatprep.mubr.msk.bf16.mxu0 %vm1542_vm0, %v1541_v0  ;;  %1466 = vmatprep.mubr.msk.bf16.mxu1 %vm1542_vm0, %v1541_v0 }
  0x52   :  { %1415 = vmatmul.mubr.bf16.gmra.mrb[24].mxu0 %v1528_v21  ;;  %1467 = vmatmul.mubr.bf16.gmra.mrb[24].mxu1 %v1529_v22 }
  0x53   :  { %1418 = vmatprep.mubr.msk.bf16.mxu0 %vm1542_vm0, %v1541_v0  ;;  %1470 = vmatprep.mubr.msk.bf16.mxu1 %vm1542_vm0, %v1541_v0 }
  0x5a   :  { %1419 = vmatmul.mubr.bf16.gmra.mrb[28].mxu0 %v1530_v23  ;;  %1471 = vmatmul.mubr.bf16.gmra.mrb[28].mxu1 %v1531_v24 }
  0x5b   :  { %1422 = vmatprep.mubr.msk.bf16.mxu0 %vm1542_vm0, %v1541_v0  ;;  %1474 = vmatprep.mubr.msk.bf16.mxu1 %vm1542_vm0, %v1541_v0 }
  0x62   :  { %1423 = vmatmul.mubr.bf16.gmra.mrb[32].mxu0 %v1532_v25  ;;  %1475 = vmatmul.mubr.bf16.gmra.mrb[32].mxu1 %v1533_v26 }
  0x63   :  { %1426 = vmatprep.mubr.msk.bf16.mxu0 %vm1542_vm0, %v1541_v0  ;;  %1478 = vmatprep.mubr.msk.bf16.mxu1 %vm1542_vm0, %v1541_v0 }
  0x6a   :  { %1427 = vmatmul.mubr.bf16.gmra.mrb[36].mxu0 %v1534_v27  ;;  %1479 = vmatmul.mubr.bf16.gmra.mrb[36].mxu1 %v1535_v28 }
  0x6b   :  { %1430 = vmatprep.mubr.msk.bf16.mxu0 %vm1542_vm0, %v1541_v0  ;;  %1482 = vmatprep.mubr.msk.bf16.mxu1 %vm1542_vm0, %v1541_v0 }
  0x72   :  { %1431 = vmatmul.mubr.bf16.gmra.mrb[40].mxu0 %v1536_v29  ;;  %1483 = vmatmul.mubr.bf16.gmra.mrb[40].mxu1 %v1537_v30 }
  0x73   :  { %1434 = vmatprep.mubr.msk.bf16.mxu0 %vm1542_vm0, %v1541_v0  ;;  %1486 = vmatprep.mubr.msk.bf16.mxu1 %vm1542_vm0, %v1541_v0 }
  0x7a   :  { %1435 = vmatmul.mubr.bf16.gmra.mrb[44].mxu0 %v1538_v31  ;;  %1487 = vmatmul.mubr.bf16.gmra.mrb[44].mxu1 %v1539_v32 }
  0x7b   :  { %1438 = vmatprep.mubr.msk.bf16.mxu0 %vm1542_vm0, %v1541_v0 }
  0x82   :  { %1439 = vmatmul.mubr.bf16.gmra.mrb[48].mxu0 %v1540_v33 }
  0xf5   :  { %v412_v34 = vpop.f32.mrb[0].mxu0  ;;  %v516_v36 = vpop.f32.mrb[0].mxu1 }
  0xf6   :  { %v1392_v37 = vpop.f32.mrb[1].mxu0  ;;  %v793_v38 = vadd.f32 %v1731_v35, %v516_v36  ;;  %v1444_v39 = vpop.f32.mrb[1].mxu1  ;;  %v767_v42 = vadd.f32 %v1731_v35, %v412_v34 }
  0xf7   :  { %v415_v40 = vpop.f32.mrb[2].mxu0  ;;  %v519_v41 = vpop.f32.mrb[2].mxu1 }
  0xf8   :  { %v768_v43 = vadd.f32 %v1731_v35, %v415_v40  ;;  %v1393_v44 = vpop.f32.mrb[3].mxu0  ;;  %v794_v45 = vadd.f32 %v1731_v35, %v519_v41  ;;  %v1445_v46 = vpop.f32.mrb[3].mxu1 }
  0xfa   :  { %v1201_v47 = vpack.c.bf16 %v768_v43, %v767_v42  ;;  %v1266_v48 = vpack.c.bf16 %v794_v45, %v793_v38 }
  0xfc   :  { %1202 = vst [vmem:[%s1860_s3] sm:$0xff] %v1201_v47   ;;  %1330 = vst [vmem:[%s1860_s3 + $0x68] sm:$0xff] %v1266_v48  }
  0xfd   :  { %v420_v49 = vpop.f32.mrb[4].mxu0  ;;  %v524_v50 = vpop.f32.mrb[4].mxu1 }
  0xfe   :  { %v1396_v51 = vpop.f32.mrb[5].mxu0  ;;  %v795_v52 = vadd.f32 %v1731_v35, %v524_v50  ;;  %v1448_v53 = vpop.f32.mrb[5].mxu1  ;;  %v769_v56 = vadd.f32 %v1731_v35, %v420_v49 }
  0xff   :  { %v423_v54 = vpop.f32.mrb[6].mxu0  ;;  %v527_v55 = vpop.f32.mrb[6].mxu1 }
 0x100   :  { %v770_v57 = vadd.f32 %v1731_v35, %v423_v54  ;;  %v1397_v58 = vpop.f32.mrb[7].mxu0  ;;  %v796_v59 = vadd.f32 %v1731_v35, %v527_v55  ;;  %v1449_v60 = vpop.f32.mrb[7].mxu1 }
 0x102   :  { %v1206_v61 = vpack.c.bf16 %v770_v57, %v769_v56  ;;  %v1271_v62 = vpack.c.bf16 %v796_v59, %v795_v52 }
 0x104   :  { %1318 = vst [vmem:[%s1860_s3 + $0x8] sm:$0xff] %v1206_v61   ;;  %1331 = vst [vmem:[%s1860_s3 + $0x70] sm:$0xff] %v1271_v62  }
 0x105   :  { %v428_v63 = vpop.f32.mrb[8].mxu0  ;;  %v532_v0 = vpop.f32.mrb[8].mxu1 }
 0x106   :  { %v1400_v1 = vpop.f32.mrb[9].mxu0  ;;  %v797_v2 = vadd.f32 %v1731_v35, %v532_v0  ;;  %v1452_v3 = vpop.f32.mrb[9].mxu1  ;;  %v771_v6 = vadd.f32 %v1731_v35, %v428_v63 }
 0x107   :  { %v431_v4 = vpop.f32.mrb[10].mxu0  ;;  %v535_v5 = vpop.f32.mrb[10].mxu1 }
 0x108   :  { %v772_v7 = vadd.f32 %v1731_v35, %v431_v4  ;;  %v1401_v8 = vpop.f32.mrb[11].mxu0  ;;  %v798_v9 = vadd.f32 %v1731_v35, %v535_v5  ;;  %v1453_v10 = vpop.f32.mrb[11].mxu1 }
 0x10a   :  { %v1211_v11 = vpack.c.bf16 %v772_v7, %v771_v6  ;;  %v1276_v12 = vpack.c.bf16 %v798_v9, %v797_v2 }
 0x10c   :  { %1319 = vst [vmem:[%s1860_s3 + $0x10] sm:$0xff] %v1211_v11   ;;  %1332 = vst [vmem:[%s1860_s3 + $0x78] sm:$0xff] %v1276_v12  }
 0x10d   :  { %v436_v13 = vpop.f32.mrb[12].mxu0  ;;  %v540_v14 = vpop.f32.mrb[12].mxu1 }
 0x10e   :  { %v1404_v15 = vpop.f32.mrb[13].mxu0  ;;  %v799_v16 = vadd.f32 %v1731_v35, %v540_v14  ;;  %v1456_v17 = vpop.f32.mrb[13].mxu1  ;;  %v773_v20 = vadd.f32 %v1731_v35, %v436_v13 }
 0x10f   :  { %v439_v18 = vpop.f32.mrb[14].mxu0  ;;  %v543_v19 = vpop.f32.mrb[14].mxu1 }
 0x110   :  { %v774_v21 = vadd.f32 %v1731_v35, %v439_v18  ;;  %v1405_v22 = vpop.f32.mrb[15].mxu0  ;;  %v800_v23 = vadd.f32 %v1731_v35, %v543_v19  ;;  %v1457_v24 = vpop.f32.mrb[15].mxu1 }
 0x112   :  { %v1216_v25 = vpack.c.bf16 %v774_v21, %v773_v20  ;;  %v1281_v26 = vpack.c.bf16 %v800_v23, %v799_v16 }
 0x114   :  { %1320 = vst [vmem:[%s1860_s3 + $0x18] sm:$0xff] %v1216_v25   ;;  %1333 = vst [vmem:[%s1860_s3 + $0x80] sm:$0xff] %v1281_v26  }
 0x115   :  { %v444_v27 = vpop.f32.mrb[16].mxu0  ;;  %v548_v28 = vpop.f32.mrb[16].mxu1 }
 0x116   :  { %v1408_v29 = vpop.f32.mrb[17].mxu0  ;;  %v801_v30 = vadd.f32 %v1731_v35, %v548_v28  ;;  %v1460_v31 = vpop.f32.mrb[17].mxu1  ;;  %v775_v34 = vadd.f32 %v1731_v35, %v444_v27 }
 0x117   :  { %v447_v32 = vpop.f32.mrb[18].mxu0  ;;  %v551_v33 = vpop.f32.mrb[18].mxu1 }
 0x118   :  { %v776_v36 = vadd.f32 %v1731_v35, %v447_v32  ;;  %v1409_v37 = vpop.f32.mrb[19].mxu0  ;;  %v802_v38 = vadd.f32 %v1731_v35, %v551_v33  ;;  %v1461_v39 = vpop.f32.mrb[19].mxu1 }
 0x11a   :  { %v1221_v40 = vpack.c.bf16 %v776_v36, %v775_v34  ;;  %v1286_v41 = vpack.c.bf16 %v802_v38, %v801_v30 }
 0x11c   :  { %1321 = vst [vmem:[%s1860_s3 + $0x20] sm:$0xff] %v1221_v40   ;;  %1334 = vst [vmem:[%s1860_s3 + $0x88] sm:$0xff] %v1286_v41  }
 0x11d   :  { %v452_v42 = vpop.f32.mrb[20].mxu0  ;;  %v556_v43 = vpop.f32.mrb[20].mxu1 }
 0x11e   :  { %v1412_v44 = vpop.f32.mrb[21].mxu0  ;;  %v803_v45 = vadd.f32 %v1731_v35, %v556_v43  ;;  %v1464_v46 = vpop.f32.mrb[21].mxu1  ;;  %v777_v49 = vadd.f32 %v1731_v35, %v452_v42 }
 0x11f   :  { %v455_v47 = vpop.f32.mrb[22].mxu0  ;;  %v559_v48 = vpop.f32.mrb[22].mxu1 }
 0x120   :  { %v778_v50 = vadd.f32 %v1731_v35, %v455_v47  ;;  %v1413_v51 = vpop.f32.mrb[23].mxu0  ;;  %v804_v52 = vadd.f32 %v1731_v35, %v559_v48  ;;  %v1465_v53 = vpop.f32.mrb[23].mxu1 }
 0x122   :  { %v1226_v54 = vpack.c.bf16 %v778_v50, %v777_v49  ;;  %v1291_v55 = vpack.c.bf16 %v804_v52, %v803_v45 }
 0x124   :  { %1322 = vst [vmem:[%s1860_s3 + $0x28] sm:$0xff] %v1226_v54   ;;  %1335 = vst [vmem:[%s1860_s3 + $0x90] sm:$0xff] %v1291_v55  }
 0x125   :  { %v460_v56 = vpop.f32.mrb[24].mxu0  ;;  %v564_v57 = vpop.f32.mrb[24].mxu1 }
 0x126   :  { %v1416_v58 = vpop.f32.mrb[25].mxu0  ;;  %v805_v59 = vadd.f32 %v1731_v35, %v564_v57  ;;  %v1468_v60 = vpop.f32.mrb[25].mxu1  ;;  %v779_v63 = vadd.f32 %v1731_v35, %v460_v56 }
 0x127   :  { %v463_v61 = vpop.f32.mrb[26].mxu0  ;;  %v567_v62 = vpop.f32.mrb[26].mxu1 }
 0x128   :  { %v780_v0 = vadd.f32 %v1731_v35, %v463_v61  ;;  %v1417_v1 = vpop.f32.mrb[27].mxu0  ;;  %v806_v2 = vadd.f32 %v1731_v35, %v567_v62  ;;  %v1469_v3 = vpop.f32.mrb[27].mxu1 }
 0x12a   :  { %v1231_v4 = vpack.c.bf16 %v780_v0, %v779_v63  ;;  %v1296_v5 = vpack.c.bf16 %v806_v2, %v805_v59 }
 0x12c   :  { %1323 = vst [vmem:[%s1860_s3 + $0x30] sm:$0xff] %v1231_v4   ;;  %1336 = vst [vmem:[%s1860_s3 + $0x98] sm:$0xff] %v1296_v5  }
 0x12d   :  { %v468_v6 = vpop.f32.mrb[28].mxu0  ;;  %v572_v7 = vpop.f32.mrb[28].mxu1 }
 0x12e   :  { %v1420_v8 = vpop.f32.mrb[29].mxu0  ;;  %v807_v9 = vadd.f32 %v1731_v35, %v572_v7  ;;  %v1472_v10 = vpop.f32.mrb[29].mxu1  ;;  %v781_v13 = vadd.f32 %v1731_v35, %v468_v6 }
 0x12f   :  { %v471_v11 = vpop.f32.mrb[30].mxu0  ;;  %v575_v12 = vpop.f32.mrb[30].mxu1 }
 0x130   :  { %v782_v14 = vadd.f32 %v1731_v35, %v471_v11  ;;  %v1421_v15 = vpop.f32.mrb[31].mxu0  ;;  %v808_v16 = vadd.f32 %v1731_v35, %v575_v12  ;;  %v1473_v17 = vpop.f32.mrb[31].mxu1 }
 0x132   :  { %v1236_v18 = vpack.c.bf16 %v782_v14, %v781_v13  ;;  %v1301_v19 = vpack.c.bf16 %v808_v16, %v807_v9 }
 0x134   :  { %1324 = vst [vmem:[%s1860_s3 + $0x38] sm:$0xff] %v1236_v18   ;;  %1337 = vst [vmem:[%s1860_s3 + $0xa0] sm:$0xff] %v1301_v19  }
 0x135   :  { %v476_v20 = vpop.f32.mrb[32].mxu0  ;;  %v580_v21 = vpop.f32.mrb[32].mxu1 }
 0x136   :  { %v1424_v22 = vpop.f32.mrb[33].mxu0  ;;  %v809_v23 = vadd.f32 %v1731_v35, %v580_v21  ;;  %v1476_v24 = vpop.f32.mrb[33].mxu1  ;;  %v783_v27 = vadd.f32 %v1731_v35, %v476_v20 }
 0x137   :  { %v479_v25 = vpop.f32.mrb[34].mxu0  ;;  %v583_v26 = vpop.f32.mrb[34].mxu1 }
 0x138   :  { %v784_v28 = vadd.f32 %v1731_v35, %v479_v25  ;;  %v1425_v29 = vpop.f32.mrb[35].mxu0  ;;  %v810_v30 = vadd.f32 %v1731_v35, %v583_v26  ;;  %v1477_v31 = vpop.f32.mrb[35].mxu1 }
 0x13a   :  { %v1241_v32 = vpack.c.bf16 %v784_v28, %v783_v27  ;;  %v1306_v33 = vpack.c.bf16 %v810_v30, %v809_v23 }
 0x13c   :  { %1325 = vst [vmem:[%s1860_s3 + $0x40] sm:$0xff] %v1241_v32   ;;  %1338 = vst [vmem:[%s1860_s3 + $0xa8] sm:$0xff] %v1306_v33  }
 0x13d   :  { %v484_v34 = vpop.f32.mrb[36].mxu0  ;;  %v588_v36 = vpop.f32.mrb[36].mxu1 }
 0x13e   :  { %v1428_v37 = vpop.f32.mrb[37].mxu0  ;;  %v811_v38 = vadd.f32 %v1731_v35, %v588_v36  ;;  %v1480_v39 = vpop.f32.mrb[37].mxu1  ;;  %v785_v42 = vadd.f32 %v1731_v35, %v484_v34 }
 0x13f   :  { %v487_v40 = vpop.f32.mrb[38].mxu0  ;;  %v591_v41 = vpop.f32.mrb[38].mxu1 }
 0x140   :  { %v786_v43 = vadd.f32 %v1731_v35, %v487_v40  ;;  %v1429_v44 = vpop.f32.mrb[39].mxu0  ;;  %v812_v45 = vadd.f32 %v1731_v35, %v591_v41  ;;  %v1481_v46 = vpop.f32.mrb[39].mxu1 }
 0x142   :  { %v1246_v47 = vpack.c.bf16 %v786_v43, %v785_v42  ;;  %v1311_v48 = vpack.c.bf16 %v812_v45, %v811_v38 }
 0x144   :  { %1326 = vst [vmem:[%s1860_s3 + $0x48] sm:$0xff] %v1246_v47   ;;  %1339 = vst [vmem:[%s1860_s3 + $0xb0] sm:$0xff] %v1311_v48  }
 0x145   :  { %v492_v49 = vpop.f32.mrb[40].mxu0  ;;  %v596_v50 = vpop.f32.mrb[40].mxu1 }
 0x146   :  { %v1432_v51 = vpop.f32.mrb[41].mxu0  ;;  %v813_v52 = vadd.f32 %v1731_v35, %v596_v50  ;;  %v1484_v53 = vpop.f32.mrb[41].mxu1  ;;  %v787_v56 = vadd.f32 %v1731_v35, %v492_v49 }
 0x147   :  { %v495_v54 = vpop.f32.mrb[42].mxu0  ;;  %v599_v55 = vpop.f32.mrb[42].mxu1 }
 0x148   :  { %v788_v57 = vadd.f32 %v1731_v35, %v495_v54  ;;  %v1433_v58 = vpop.f32.mrb[43].mxu0  ;;  %v814_v59 = vadd.f32 %v1731_v35, %v599_v55  ;;  %v1485_v60 = vpop.f32.mrb[43].mxu1 }
 0x14a   :  { %v1251_v61 = vpack.c.bf16 %v788_v57, %v787_v56  ;;  %v1316_v62 = vpack.c.bf16 %v814_v59, %v813_v52 }
 0x14c   :  { %1327 = vst [vmem:[%s1860_s3 + $0x50] sm:$0xff] %v1251_v61   ;;  %1340 = vst [vmem:[%s1860_s3 + $0xb8] sm:$0xff] %v1316_v62  }
 0x14d   :  { %v500_v63 = vpop.f32.mrb[44].mxu0  ;;  %v604_v0 = vpop.f32.mrb[44].mxu1 }
 0x14e   :  { %v1436_v1 = vpop.f32.mrb[45].mxu0  ;;  %v815_v2 = vadd.f32 %v1731_v35, %v604_v0  ;;  %v1488_v3 = vpop.f32.mrb[45].mxu1  ;;  %v789_v6 = vadd.f32 %v1731_v35, %v500_v63 }
 0x14f   :  { %v503_v4 = vpop.f32.mrb[46].mxu0  ;;  %v607_v5 = vpop.f32.mrb[46].mxu1 }
 0x150   :  { %v790_v7 = vadd.f32 %v1731_v35, %v503_v4  ;;  %v1437_v8 = vpop.f32.mrb[47].mxu0  ;;  %v1197_v9 = vpack.c.bf16 %v815_v2, %v815_v2  ;;  %v1489_v10 = vpop.f32.mrb[47].mxu1 }
 0x152   :  { %v1256_v11 = vpack.c.bf16 %v790_v7, %v789_v6  ;;  %1061 = vst [vmem:[%s1860_s3 + $0xc0] sm:$0xf] %v1197_v9 }
 0x154   :  { %1328 = vst [vmem:[%s1860_s3 + $0x58] sm:$0xff] %v1256_v11  }
 0x155   :  { %v508_v12 = vpop.f32.mrb[48].mxu0 }
 0x156   :  { %v1440_v13 = vpop.f32.mrb[49].mxu0  ;;  %v791_v15 = vadd.f32 %v1731_v35, %v508_v12 }
 0x157   :  { %v511_v14 = vpop.f32.mrb[50].mxu0 }
 0x158   :  { %v792_v16 = vadd.f32 %v1731_v35, %v511_v14  ;;  %v1441_v17 = vpop.f32.mrb[51].mxu0 }
 0x15a   :  { %v1261_v18 = vpack.c.bf16 %v792_v16, %v791_v15 }
 0x15c   :  { %1329 = vst [vmem:[%s1860_s3 + $0x60] sm:$0xff] %v1261_v18  }

</bundles_post_ra>
